<compile_context>
chip_gen: v7x
topology: tpu7x:2x2x1
jax: 0.10.0
libtpu: 0.0.40
codegen_flags: <defaults>
</compile_context>

<pallas_src>
import functools

import jax
import jax.numpy as jnp
from jax.experimental import pallas as pl
from jax.experimental.pallas import tpu as pltpu

LANES = 128          # TPU lane width; output channels padded to a multiple of this.
BN_EPS = 1e-5


def _round_up(x, m):
    return (x + m - 1) // m * m


@functools.lru_cache(maxsize=None)
def _vmem_plan():
    """Generation-aware VMEM budget: (per-call tiling budget, vmem_limit_bytes)."""
    cap = 64 * 1024 * 1024                       # conservative default (v7x per-TC VMEM)
    try:
        info = pltpu.get_tpu_info()
        c = getattr(info, "vmem_capacity_bytes", None)
        if c:
            cap = int(c)
    except Exception:
        pass
    limit = min(int(cap * 0.75), 96 * 1024 * 1024)   # ~96 MiB v5e/v6e, ~48 MiB v7x
    budget = limit // 2                              # headroom for scratch / regalloc
    return budget, limit


def _pick_tile_rows(mp, target):
    """Largest multiple-of-8 divisor of mp that is <= target, preferring >= 2 tiles."""
    cap = min(target, mp)
    if mp >= 16:
        cap = min(cap, mp // 2)        # keep nb >= 2: megacore sharding + pipelining
    cap = max(8, (cap // 8) * 8)
    for d in range(cap, 7, -8):
        if mp % d == 0:
            return d
    return 8


# ---------------------------------------------------------------------------
# Kernel: single GEMM (im2col rows x tap-major weights) + bias + ReLU, plus
# per-tile BatchNorm partial statistics (sum, sum of squares) of the f32 result.
# ---------------------------------------------------------------------------
def _gemm_relu_stats_kernel(x_ref, w_ref, b_ref, y_ref, st_ref, *, tm, m_valid):
    # x_ref : (tm, kpad)      bf16 im2col rows (one row per output pixel)
    # w_ref : (kpad, coutp)   bf16 weights (prev-layer BN scale already folded in)
    # b_ref : (1, coutp)      f32 bias (prev-layer BN shift already folded in)
    # y_ref : (tm, coutp)     conv+bias+ReLU (pre-BN); bf16 for inner layers, f32 last
    # st_ref: (1, 2, coutp)   f32 per-tile [sum, sum_sq]
    acc = jnp.dot(x_ref[...], w_ref[...], preferred_element_type=jnp.float32)
    y = jnp.maximum(acc + b_ref[...], 0.0)
    if m_valid is not None:
        # Static gate: only emitted when the row count was padded up to a multiple of 8.
        row = pl.program_id(0) * tm + jax.lax.broadcasted_iota(jnp.int32, y.shape, 0)
        y = jnp.where(row < m_valid, y, 0.0)
    y_ref[...] = y.astype(y_ref.dtype)
    st_ref[0, 0:1, :] = jnp.sum(y, axis=0, keepdims=True)
    st_ref[0, 1:2, :] = jnp.sum(y * y, axis=0, keepdims=True)


def _conv_relu_stats(patches, w_mat, bias, *, m_valid, out_dtype):
    mp, kpad = patches.shape
    coutp = w_mat.shape[-1]
    budget, limit = _vmem_plan()
    # Per-row VMEM: double-buffered bf16 input + double-buffered output + f32 working set.
    per_row = 2 * 2 * kpad + 2 * coutp * jnp.dtype(out_dtype).itemsize + coutp * 4
    target = int(max(256, min(2048, budget // max(per_row, 1))))
    tm = _pick_tile_rows(mp, target)
    nb = mp // tm

    kern = functools.partial(_gemm_relu_stats_kernel, tm=tm,
                             m_valid=None if m_valid == mp else m_valid)
    return pl.pallas_call(
        kern,
        out_shape=(
            jax.ShapeDtypeStruct((mp, coutp), out_dtype),
            jax.ShapeDtypeStruct((nb, 2, coutp), jnp.float32),
        ),
        grid=(nb,),
        in_specs=[
            pl.BlockSpec((tm, kpad), lambda i: (i, 0)),
            pl.BlockSpec((kpad, coutp), lambda i: (0, 0)),
            pl.BlockSpec((1, coutp), lambda i: (0, 0)),
        ],
        out_specs=(
            pl.BlockSpec((tm, coutp), lambda i: (i, 0)),
            pl.BlockSpec((1, 2, coutp), lambda i: (i, 0, 0)),
        ),
        compiler_params=pltpu.CompilerParams(
            dimension_semantics=("parallel",),      # independent row tiles -> megacore
            vmem_limit_bytes=limit,
        ),
    )(patches, w_mat, bias)


# ---------------------------------------------------------------------------
# JAX-side glue: stride-2 im2col (real channels only) and BatchNorm scale/shift.
# ---------------------------------------------------------------------------
def _im2col_s2(x, kh, kw, ho, wo):
    """x: (N, H, W, C) channels-last -> (N*ho*wo, kh*kw*C) valid stride-2 patches."""
    n, _, _, c = x.shape
    cols = []
    for dh in range(kh):
        for dw in range(kw):
            cols.append(x[:, dh:dh + 2 * (ho - 1) + 1:2,
                          dw:dw + 2 * (wo - 1) + 1:2, :])
    p = jnp.concatenate(cols, axis=-1)              # (N, ho, wo, kh*kw*C)
    return p.reshape(n * ho * wo, kh * kw * c)


def _bn_scale_shift(stats, count, gamma, beta):
    mean = stats[0] / count
    var = jnp.maximum(stats[1] / count - mean * mean, 0.0)   # biased var (training mode)
    scale = gamma * jax.lax.rsqrt(var + BN_EPS)
    shift = beta - mean * scale
    return scale, shift


def init_s_encdec_params(key, channels, kernels):
    """Encoder: [Conv2d(c[i], c[i+1], k[i], stride=2, bias=True) -> ReLU -> BN(c[i+1])]*."""
    params = []
    for i, k in enumerate(kernels):
        cin, cout = channels[i], channels[i + 1]
        key, wkey, bkey = jax.random.split(key, 3)
        fan_in = cin * k * k
        bound = 1.0 / (fan_in ** 0.5)
        w = jax.random.uniform(wkey, (k, k, cin, cout), jnp.float32, -bound, bound)  # HWIO
        b = jax.random.uniform(bkey, (cout,), jnp.float32, -bound, bound)
        gamma = jnp.ones((cout,), jnp.float32)       # BatchNorm2d default affine init
        beta = jnp.zeros((cout,), jnp.float32)
        params.append((w, b, gamma, beta))
    return params


@jax.jit
def s_encdec_forward(x, params):
    """Matches S_EncDec.forward: flatten leading dims -> layers -> restore leading dims."""
    in_shape = x.shape
    x = x.reshape((-1,) + in_shape[-3:])            # (N, C, H, W)
    n = x.shape[0]
    act = jnp.transpose(x, (0, 2, 3, 1))            # channels-last, real channels only
    cur_h, cur_w = act.shape[1], act.shape[2]

    pending = None      # (stats(2,cout), count, gamma, beta) of the previous layer
    n_layers = len(params)
    for li, (w, b, gamma, beta) in enumerate(params):
        kh, kw, cin, cout = w.shape
        ho = (cur_h - kh) // 2 + 1
        wo = (cur_w - kw) // 2 + 1
        m = n * ho * wo
        mp = _round_up(m, 8)                        # sublane-aligned row count
        coutp = _round_up(cout, LANES)              # lane-dense output channels

        if pending is not None:
            # Fold the previous layer's BatchNorm into this conv: scale -> weights,
            # shift -> bias (tiny f32 op on the weights; activations stay pre-BN).
            scale, shift = _bn_scale_shift(*pending)
            b = b + jnp.einsum('hwio,i->o', w, shift)
            w = w * scale[None, None, :, None]

        k = kh * kw * cin
        kpad = _round_up(k, 8)

        # Real-channel im2col (fuses with the slice of the previous padded activation
        # and, for the first layer, with the NCHW->NHWC transpose).  bf16 MXU feed.
        patches = _im2col_s2(act.astype(jnp.bfloat16), kh, kw, ho, wo)   # (m, k)
        patches = jnp.pad(patches, ((0, mp - m), (0, kpad - k)))
        w_mat = jnp.pad(w.reshape(k, cout), ((0, kpad - k), (0, coutp - cout)))
        w_mat = w_mat.astype(jnp.bfloat16)
        bias = jnp.pad(b, (0, coutp - cout)).astype(jnp.float32).reshape(1, coutp)

        is_last = (li == n_layers - 1)
        out_dtype = jnp.float32 if is_last else jnp.bfloat16
        y, st_part = _conv_relu_stats(patches, w_mat, bias,
                                      m_valid=m, out_dtype=out_dtype)

        stats = jnp.sum(st_part, axis=0)[:, :cout]  # globally reduced BN sums (2, cout)
        pending = (stats, float(m), gamma, beta)
        act = y[:m].reshape(n, ho, wo, coutp)[..., :cout]   # carry real channels only
        cur_h, cur_w = ho, wo

    # Final layer's BatchNorm in plain JAX: fuses with the transpose/reshape epilogue.
    scale, shift = _bn_scale_shift(*pending)
    out = act.astype(jnp.float32) * scale + shift   # (n, ho, wo, cout)
    out = jnp.transpose(out, (0, 3, 1, 2))          # back to the public NCHW API
    return out.reshape(in_shape[:-3] + out.shape[-3:])


if __name__ == "__main__":
    # ST_Encoder's spatial encoder uses channels[:-1] / kernels[:-1].
    channels = [4, 8, 16]
    kernels = [3, 3]

    key = jax.random.PRNGKey(0)
    key, xkey = jax.random.split(key)
    # (seq, batch, C, H, W) -- exercises the leading-dim view/restore logic.
    x = jax.random.normal(xkey, (8, 2, 4, 16, 16), jnp.float32)
    params = init_s_encdec_params(key, channels, kernels)

    out = s_encdec_forward(x, params)
    jax.block_until_ready(out)

    # spatial: 16 -> (16-3)//2+1 = 7 -> (7-3)//2+1 = 3 ; channels: 4 -> 8 -> 16
    assert out.shape == (8, 2, 16, 3, 3), out.shape
    assert out.dtype == jnp.float32
    print("KERNEL_OK")
</pallas_src>

<mosaic_0001>
module attributes {stable_mosaic.version = 11 : i64} {
  func.func @_gemm_relu_stats_kernel(%arg0: i32, %arg1: memref<392x40xbf16, #tpu.memory_space<vmem>>, %arg2: memref<40x128xbf16, #tpu.memory_space<vmem>>, %arg3: memref<1x128xf32, #tpu.memory_space<vmem>>, %arg4: memref<392x128xbf16, #tpu.memory_space<vmem>>, %arg5: memref<1x2x128xf32, #tpu.memory_space<vmem>>) attributes {dimension_semantics = [#tpu.dimension_semantics<parallel>], iteration_bounds = array<i64: 2>, scalar_prefetch = 0 : i64, scratch_operands = 0 : i64, tpu.core_type = #tpu.core_type<tc>, window_params = [{transform_indices = @transform_0, window_bounds = array<i64: 392, 40>}, {pipeline_mode = #tpu.pipeline_mode<synchronous>, transform_indices = @transform_1, window_bounds = array<i64: 40, 128>}, {pipeline_mode = #tpu.pipeline_mode<synchronous>, transform_indices = @transform_2, window_bounds = array<i64: 1, 128>}, {transform_indices = @transform_3, window_bounds = array<i64: 392, 128>}, {transform_indices = @transform_4, window_bounds = array<i64: 1, 2, 128>}]} {
    %c0 = arith.constant 0 : index
    %c0_0 = arith.constant 0 : index
    %0 = vector.load %arg1[%c0, %c0_0] : memref<392x40xbf16, #tpu.memory_space<vmem>>, vector<392x40xbf16>
    %c0_1 = arith.constant 0 : index
    %c0_2 = arith.constant 0 : index
    %1 = vector.load %arg2[%c0_1, %c0_2] : memref<40x128xbf16, #tpu.memory_space<vmem>>, vector<40x128xbf16>
    %cst = arith.constant dense<0.000000e+00> : vector<392x128xf32>
    %2 = tpu.matmul %0, %1, %cst {dimension_numbers = #tpu.dot_dimension_numbers<[1], [0], [0], [1], [0, 0, 1, 1], [], []>} : vector<392x40xbf16>, vector<40x128xbf16>, vector<392x128xf32> -> vector<392x128xf32>
    %c0_3 = arith.constant 0 : index
    %c0_4 = arith.constant 0 : index
    %3 = vector.load %arg3[%c0_3, %c0_4] : memref<1x128xf32, #tpu.memory_space<vmem>>, vector<1x128xf32>
    %4 = vector.broadcast %3 : vector<1x128xf32> to vector<392x128xf32>
    %5 = arith.addf %2, %4 : vector<392x128xf32>
    %cst_5 = arith.constant 0.000000e+00 : f32
    %6 = vector.broadcast %cst_5 : f32 to vector<392x128xf32>
    %7 = arith.maximumf %5, %6 : vector<392x128xf32>
    %8 = arith.truncf %7 : vector<392x128xf32> to vector<392x128xbf16>
    %c0_6 = arith.constant 0 : index
    %c0_7 = arith.constant 0 : index
    %9 = vector.load %arg4[%c0_6, %c0_7] : memref<392x128xbf16, #tpu.memory_space<vmem>>, vector<392x128xbf16>
    tpu.vector_store %arg4[%c0_6, %c0_7], %8 {strides = array<i32>} : memref<392x128xbf16, #tpu.memory_space<vmem>>, vector<392x128xbf16>,
    %cst_8 = arith.constant dense<0.000000e+00> : vector<128xf32>
    %10 = vector.multi_reduction <add>, %7, %cst_8 [0] : vector<392x128xf32> to vector<128xf32>
    %11 = vector.shape_cast %10 : vector<128xf32> to vector<1x128xf32>
    %c0_9 = arith.constant 0 : index
    %c0_10 = arith.constant 0 : index
    %c0_11 = arith.constant 0 : index
    %12 = vector.load %arg5[%c0_9, %c0_10, %c0_11] : memref<1x2x128xf32, #tpu.memory_space<vmem>>, vector<1x1x128xf32>
    %13 = vector.shape_cast %12 : vector<1x1x128xf32> to vector<1x128xf32>
    %14 = vector.shape_cast %11 : vector<1x128xf32> to vector<1x1x128xf32>
    tpu.vector_store %arg5[%c0_9, %c0_10, %c0_11], %14 {strides = array<i32>} : memref<1x2x128xf32, #tpu.memory_space<vmem>>, vector<1x1x128xf32>,
    %15 = arith.mulf %7, %7 : vector<392x128xf32>
    %cst_12 = arith.constant dense<0.000000e+00> : vector<128xf32>
    %16 = vector.multi_reduction <add>, %15, %cst_12 [0] : vector<392x128xf32> to vector<128xf32>
    %17 = vector.shape_cast %16 : vector<128xf32> to vector<1x128xf32>
    %c0_13 = arith.constant 0 : index
    %c1 = arith.constant 1 : index
    %c0_14 = arith.constant 0 : index
    %18 = vector.load %arg5[%c0_13, %c1, %c0_14] : memref<1x2x128xf32, #tpu.memory_space<vmem>>, vector<1x1x128xf32>
    %19 = vector.shape_cast %18 : vector<1x1x128xf32> to vector<1x128xf32>
    %20 = vector.shape_cast %17 : vector<1x128xf32> to vector<1x1x128xf32>
    tpu.vector_store %arg5[%c0_13, %c1, %c0_14], %20 {strides = array<i32>} : memref<1x2x128xf32, #tpu.memory_space<vmem>>, vector<1x1x128xf32>,
    return
  }
  func.func @transform_0(%arg0: i32) -> (i32, i32) {
    %c0_i32 = arith.constant 0 : i32
    %c0_i32_0 = arith.constant 0 : i32
    return %arg0, %c0_i32 : i32, i32
  }
  func.func @transform_1(%arg0: i32) -> (i32, i32) {
    %c0_i32 = arith.constant 0 : i32
    %c0_i32_0 = arith.constant 0 : i32
    %c0_i32_1 = arith.constant 0 : i32
    return %c0_i32, %c0_i32_0 : i32, i32
  }
  func.func @transform_2(%arg0: i32) -> (i32, i32) {
    %c0_i32 = arith.constant 0 : i32
    %c0_i32_0 = arith.constant 0 : i32
    %c0_i32_1 = arith.constant 0 : i32
    return %c0_i32, %c0_i32_0 : i32, i32
  }
  func.func @transform_3(%arg0: i32) -> (i32, i32) {
    %c0_i32 = arith.constant 0 : i32
    %c0_i32_0 = arith.constant 0 : i32
    return %arg0, %c0_i32 : i32, i32
  }
  func.func @transform_4(%arg0: i32) -> (i32, i32, i32) {
    %c0_i32 = arith.constant 0 : i32
    %c0_i32_0 = arith.constant 0 : i32
    %c0_i32_1 = arith.constant 0 : i32
    return %arg0, %c0_i32, %c0_i32_0 : i32, i32, i32
  }
}

module attributes {stable_mosaic.version = 11 : i64} {
  func.func @_gemm_relu_stats_kernel(%arg0: i32, %arg1: memref<72x72xbf16, #tpu.memory_space<vmem>>, %arg2: memref<72x128xbf16, #tpu.memory_space<vmem>>, %arg3: memref<1x128xf32, #tpu.memory_space<vmem>>, %arg4: memref<72x128xf32, #tpu.memory_space<vmem>>, %arg5: memref<1x2x128xf32, #tpu.memory_space<vmem>>) attributes {dimension_semantics = [#tpu.dimension_semantics<parallel>], iteration_bounds = array<i64: 2>, scalar_prefetch = 0 : i64, scratch_operands = 0 : i64, tpu.core_type = #tpu.core_type<tc>, window_params = [{transform_indices = @transform_0, window_bounds = array<i64: 72, 72>}, {pipeline_mode = #tpu.pipeline_mode<synchronous>, transform_indices = @transform_1, window_bounds = array<i64: 72, 128>}, {pipeline_mode = #tpu.pipeline_mode<synchronous>, transform_indices = @transform_2, window_bounds = array<i64: 1, 128>}, {transform_indices = @transform_3, window_bounds = array<i64: 72, 128>}, {transform_indices = @transform_4, window_bounds = array<i64: 1, 2, 128>}]} {
    %c0 = arith.constant 0 : index
    %c0_0 = arith.constant 0 : index
    %0 = vector.load %arg1[%c0, %c0_0] : memref<72x72xbf16, #tpu.memory_space<vmem>>, vector<72x72xbf16>
    %c0_1 = arith.constant 0 : index
    %c0_2 = arith.constant 0 : index
    %1 = vector.load %arg2[%c0_1, %c0_2] : memref<72x128xbf16, #tpu.memory_space<vmem>>, vector<72x128xbf16>
    %cst = arith.constant dense<0.000000e+00> : vector<72x128xf32>
    %2 = tpu.matmul %0, %1, %cst {dimension_numbers = #tpu.dot_dimension_numbers<[1], [0], [0], [1], [0, 0, 1, 1], [], []>} : vector<72x72xbf16>, vector<72x128xbf16>, vector<72x128xf32> -> vector<72x128xf32>
    %c0_3 = arith.constant 0 : index
    %c0_4 = arith.constant 0 : index
    %3 = vector.load %arg3[%c0_3, %c0_4] : memref<1x128xf32, #tpu.memory_space<vmem>>, vector<1x128xf32>
    %4 = vector.broadcast %3 : vector<1x128xf32> to vector<72x128xf32>
    %5 = arith.addf %2, %4 : vector<72x128xf32>
    %cst_5 = arith.constant 0.000000e+00 : f32
    %6 = vector.broadcast %cst_5 : f32 to vector<72x128xf32>
    %7 = arith.maximumf %5, %6 : vector<72x128xf32>
    %c0_6 = arith.constant 0 : index
    %c0_7 = arith.constant 0 : index
    %8 = vector.load %arg4[%c0_6, %c0_7] : memref<72x128xf32, #tpu.memory_space<vmem>>, vector<72x128xf32>
    tpu.vector_store %arg4[%c0_6, %c0_7], %7 {strides = array<i32>} : memref<72x128xf32, #tpu.memory_space<vmem>>, vector<72x128xf32>,
    %cst_8 = arith.constant dense<0.000000e+00> : vector<128xf32>
    %9 = vector.multi_reduction <add>, %7, %cst_8 [0] : vector<72x128xf32> to vector<128xf32>
    %10 = vector.shape_cast %9 : vector<128xf32> to vector<1x128xf32>
    %c0_9 = arith.constant 0 : index
    %c0_10 = arith.constant 0 : index
    %c0_11 = arith.constant 0 : index
    %11 = vector.load %arg5[%c0_9, %c0_10, %c0_11] : memref<1x2x128xf32, #tpu.memory_space<vmem>>, vector<1x1x128xf32>
    %12 = vector.shape_cast %11 : vector<1x1x128xf32> to vector<1x128xf32>
    %13 = vector.shape_cast %10 : vector<1x128xf32> to vector<1x1x128xf32>
    tpu.vector_store %arg5[%c0_9, %c0_10, %c0_11], %13 {strides = array<i32>} : memref<1x2x128xf32, #tpu.memory_space<vmem>>, vector<1x1x128xf32>,
    %14 = arith.mulf %7, %7 : vector<72x128xf32>
    %cst_12 = arith.constant dense<0.000000e+00> : vector<128xf32>
    %15 = vector.multi_reduction <add>, %14, %cst_12 [0] : vector<72x128xf32> to vector<128xf32>
    %16 = vector.shape_cast %15 : vector<128xf32> to vector<1x128xf32>
    %c0_13 = arith.constant 0 : index
    %c1 = arith.constant 1 : index
    %c0_14 = arith.constant 0 : index
    %17 = vector.load %arg5[%c0_13, %c1, %c0_14] : memref<1x2x128xf32, #tpu.memory_space<vmem>>, vector<1x1x128xf32>
    %18 = vector.shape_cast %17 : vector<1x1x128xf32> to vector<1x128xf32>
    %19 = vector.shape_cast %16 : vector<1x128xf32> to vector<1x1x128xf32>
    tpu.vector_store %arg5[%c0_13, %c1, %c0_14], %19 {strides = array<i32>} : memref<1x2x128xf32, #tpu.memory_space<vmem>>, vector<1x1x128xf32>,
    return
  }
  func.func @transform_0(%arg0: i32) -> (i32, i32) {
    %c0_i32 = arith.constant 0 : i32
    %c0_i32_0 = arith.constant 0 : i32
    return %arg0, %c0_i32 : i32, i32
  }
  func.func @transform_1(%arg0: i32) -> (i32, i32) {
    %c0_i32 = arith.constant 0 : i32
    %c0_i32_0 = arith.constant 0 : i32
    %c0_i32_1 = arith.constant 0 : i32
    return %c0_i32, %c0_i32_0 : i32, i32
  }
  func.func @transform_2(%arg0: i32) -> (i32, i32) {
    %c0_i32 = arith.constant 0 : i32
    %c0_i32_0 = arith.constant 0 : i32
    %c0_i32_1 = arith.constant 0 : i32
    return %c0_i32, %c0_i32_0 : i32, i32
  }
  func.func @transform_3(%arg0: i32) -> (i32, i32) {
    %c0_i32 = arith.constant 0 : i32
    %c0_i32_0 = arith.constant 0 : i32
    return %arg0, %c0_i32 : i32, i32
  }
  func.func @transform_4(%arg0: i32) -> (i32, i32, i32) {
    %c0_i32 = arith.constant 0 : i32
    %c0_i32_0 = arith.constant 0 : i32
    %c0_i32_1 = arith.constant 0 : i32
    return %arg0, %c0_i32, %c0_i32_0 : i32, i32, i32
  }
}

</mosaic_0001>

<bundles_post_ra>
// kernel: s_encdec_forward.2
= control target key start
LH: loop header
LB: loop body
LE: loop exit
PB: predicated region body
PF: predicated region fallthrough
CT: control target
= control target key end

     0   :  { %s1783_s15 = smov 0   ;;  %s2152_s0 = inlined_call_operand.vmem [shape: bf16[784,40], index: 0, kind: input, shape index: {}]   ;;  %s2153_s1 = inlined_call_operand.vmem [shape: bf16[40,128], index: 1, kind: input, shape index: {}]   ;;  %s2154_s2 = inlined_call_operand.vmem [shape: f32[1,128], index: 2, kind: input, shape index: {}]   ;;  %s2155_s3 = inlined_call_operand.vmem [shape: bf16[784,128], index: 3, kind: output, shape index: {0}]   ;;  %s2156_s4 = inlined_call_operand.vmem [shape: f32[2,2,128], index: 4, kind: output, shape index: {1}]  }
   0x1 LB: > { %s1789_s16 = sadd.s32 4294967295, %s1754_s15   ;;  %p1269_p0 = scmp.ge.s32.totalorder %s1754_s15, 1  ;;  %s1754_s15 = sphi %s1783_s15, %s15_s15  }
   0x2   : > { %p166_p1 = scmp.lt.s32.totalorder %s1754_s15, 3 }
   0x4   : > { %p167_p2 = pnand %p1269_p0, %p166_p1 }
   0x5   : > { %v1720_v0 = vld [vmem:[%s2153_s1] sm:$0xff] (!%p167_p2)   ;;  %v1756_v1 = vmov (!%p167_p2), 0.0   ;;  %v1721_v2 = vld [vmem:[%s2153_s1 + $0x8] sm:$0xff] (!%p167_p2)   ;;  %s196_s21 = smul.u32 (!%p167_p2), 49, %s1789_s16  ;;  %v1722_v3 = vld [vmem:[%s2153_s1 + $0x10] ss:$0 sps:$4 sm:$0xff] (!%p167_p2)  }
   0x6   : > { %170 = sbr.rel (%p167_p2) target bundleno = 395 (0x18b), region = 32  ;;  %1598 = vmatprep.subr.bf16.mxu0 (!%p167_p2), %v1756_v1  ;;  %1704 = vmatprep.subr.bf16.mxu1 (!%p167_p2), %v1756_v1  ;;  %vm1757_vm0 = vmmov (!%p167_p2), 0   ;;  %vm488_vm1 = vcmask (!%p167_p2), 1043456   ;;  %vm412_vm2 = vcmask (!%p167_p2), 326656   ;;  %v1922_v30 = vld [vmem:[%s2154_s2] ss:$0 sm:$0xff] (!%p167_p2) }
   0x7   : > { %1599 = vmatpush3.bf16.msra.mxu0 (!%p167_p2), %v1720_v0  ;;  %1707 = vmatpush3.bf16.msra.mxu1 (!%p167_p2), %v1720_v0  ;;  %p197_p3 = scmp.lt.s32.totalorder (!%p167_p2), %s196_s21, 97  ;;  %v490_v4 = vsel (!%p167_p2), %vm488_vm1, %v1722_v3, 0  ;;  %p208_p4 = scmp.lt.s32.totalorder (!%p167_p2), %s1789_s16, 1 }
   0x8   : > { %1600 = vmatprep.subr.bf16.mxu0 (!%p167_p2), %v1756_v1  ;;  %1604 = vmatprep.mubr.msk.bf16.mxu0 (!%p167_p2), %vm1757_vm0, %v1756_v1 }
   0x9   : > { %1705 = vmatprep.subr.bf16.mxu1 (!%p167_p2), %v1756_v1  ;;  %1656 = vmatprep.mubr.msk.bf16.mxu1 (!%p167_p2), %vm1757_vm0, %v1756_v1 }
   0xb   : > { %1601 = vmatpush3.bf16.msra.mxu0 (!%p167_p2), %v1721_v2  ;;  %1708 = vmatpush3.bf16.msra.mxu1 (!%p167_p2), %v1721_v2 }
   0xc   : > { %1602 = vmatprep.subr.bf16.mxu0 (!%p167_p2), %v1756_v1  ;;  %1706 = vmatprep.subr.bf16.mxu1 (!%p167_p2), %v1756_v1 }
   0xd   : > { %s2158_s21 = smov (!%p197_p3, %s196_s21), 97  ;;  %s2160_s16 = smov (!%p208_p4, %s1789_s16), 1 }
   0xe   : > { %s1270_s24 = sshll.u32 %s2158_s21, 2  ;;  %s1272_s7 = sshll.u32 %s2160_s16, 1 }
   0xf   : > { %s1821_s27 = scalar_lea.vmem %s2152_s0, %s1270_s24  ;;  %1603 = vmatpush3.bf16.msra.mxu0 %v490_v4  ;;  %1709 = vmatpush3.bf16.msra.mxu1 %v490_v4  ;;  %s1931_s6 = scalar_lea.vmem %s2155_s3, %s1270_s24 }
  0x10   : > { %v1723_v5 = vld [vmem:[%s1821_s27] sm:$0xff]   ;;  %v1724_v6 = vld [vmem:[%s1821_s27 + $0x8] sm:$0xff]   ;;  %v1732_v8 = vld [vmem:[%s1821_s27 + $0x70] sm:$0xff]   ;;  %s211_s10 = scalar_lea.vmem %s2156_s4, %s1272_s7 }
  0x11   : > { %v1730_v7 = vld [vmem:[%s1821_s27 + $0x68] sm:$0xff]   ;;  %v1725_v9 = vld [vmem:[%s1821_s27 + $0x10] sm:$0xff]   ;;  %v1734_v10 = vld [vmem:[%s1821_s27 + $0x78] sm:$0xff]  }
  0x12   : > { %1605 = vmatmul.mubr.msk.bf16.vlgmr.msra.gmra.mrb[0].mxu0 %vm412_vm2, %v1723_v5  ;;  %1657 = vmatmul.mubr.msk.bf16.vlgmr.msra.gmra.mrb[0].mxu1 %vm412_vm2, %v1730_v7  ;;  %v1726_v11 = vld [vmem:[%s1821_s27 + $0x18] sm:$0xff]   ;;  %v1736_v12 = vld [vmem:[%s1821_s27 + $0x80] sm:$0xff]   ;;  %v1738_v14 = vld [vmem:[%s1821_s27 + $0x88] sm:$0xff]  }
  0x13   : > { %1608 = vmatprep.mubr.msk.bf16.mxu0 %vm1757_vm0, %v1756_v1  ;;  %1660 = vmatprep.mubr.msk.bf16.mxu1 %vm1757_vm0, %v1756_v1  ;;  %v1727_v13 = vld [vmem:[%s1821_s27 + $0x20] sm:$0xff]   ;;  %v1728_v15 = vld [vmem:[%s1821_s27 + $0x28] sm:$0xff]   ;;  %v1740_v16 = vld [vmem:[%s1821_s27 + $0x90] sm:$0xff]  }
  0x14   : > { %v1729_v17 = vld [vmem:[%s1821_s27 + $0x30] sm:$0xff]   ;;  %v1742_v18 = vld [vmem:[%s1821_s27 + $0x98] sm:$0xff]   ;;  %v1743_v20 = vld [vmem:[%s1821_s27 + $0xa0] sm:$0xff]  }
  0x15   : > { %v1731_v19 = vld [vmem:[%s1821_s27 + $0x38] sm:$0xff]   ;;  %v1733_v21 = vld [vmem:[%s1821_s27 + $0x40] sm:$0xff]   ;;  %v1744_v22 = vld [vmem:[%s1821_s27 + $0xa8] sm:$0xff]  }
  0x16   : > { %v1735_v23 = vld [vmem:[%s1821_s27 + $0x48] sm:$0xff]   ;;  %v1745_v24 = vld [vmem:[%s1821_s27 + $0xb0] sm:$0xff]   ;;  %v1746_v26 = vld [vmem:[%s1821_s27 + $0xb8] sm:$0xff]  }
  0x17   : > { %v1737_v25 = vld [vmem:[%s1821_s27 + $0x50] sm:$0xff]   ;;  %v1739_v27 = vld [vmem:[%s1821_s27 + $0x58] sm:$0xff]   ;;  %v1747_v28 = vld [vmem:[%s1821_s27 + $0xc0] ss:$0 sps:$4 sm:$0xff]  }
  0x18   : > { %v1741_v29 = vld [vmem:[%s1821_s27 + $0x60] sm:$0xff]  }
  0x1a   : > { %1609 = vmatmul.mubr.msk.bf16.gmra.mrb[4].mxu0 %vm412_vm2, %v1724_v6  ;;  %1661 = vmatmul.mubr.msk.bf16.gmra.mrb[4].mxu1 %vm412_vm2, %v1732_v8 }
  0x1b   : > { %1612 = vmatprep.mubr.msk.bf16.mxu0 %vm1757_vm0, %v1756_v1  ;;  %1664 = vmatprep.mubr.msk.bf16.mxu1 %vm1757_vm0, %v1756_v1 }
  0x22   : > { %1613 = vmatmul.mubr.msk.bf16.gmra.mrb[8].mxu0 %vm412_vm2, %v1725_v9  ;;  %1665 = vmatmul.mubr.msk.bf16.gmra.mrb[8].mxu1 %vm412_vm2, %v1734_v10 }
  0x23   : > { %1616 = vmatprep.mubr.msk.bf16.mxu0 %vm1757_vm0, %v1756_v1  ;;  %1668 = vmatprep.mubr.msk.bf16.mxu1 %vm1757_vm0, %v1756_v1 }
  0x2a   : > { %1617 = vmatmul.mubr.msk.bf16.gmra.mrb[12].mxu0 %vm412_vm2, %v1726_v11  ;;  %1669 = vmatmul.mubr.msk.bf16.gmra.mrb[12].mxu1 %vm412_vm2, %v1736_v12 }
  0x2b   : > { %1620 = vmatprep.mubr.msk.bf16.mxu0 %vm1757_vm0, %v1756_v1  ;;  %1672 = vmatprep.mubr.msk.bf16.mxu1 %vm1757_vm0, %v1756_v1 }
  0x32   : > { %1621 = vmatmul.mubr.msk.bf16.gmra.mrb[16].mxu0 %vm412_vm2, %v1727_v13  ;;  %1673 = vmatmul.mubr.msk.bf16.gmra.mrb[16].mxu1 %vm412_vm2, %v1738_v14 }
  0x33   : > { %1624 = vmatprep.mubr.msk.bf16.mxu0 %vm1757_vm0, %v1756_v1  ;;  %1676 = vmatprep.mubr.msk.bf16.mxu1 %vm1757_vm0, %v1756_v1 }
  0x3a   : > { %1625 = vmatmul.mubr.msk.bf16.gmra.mrb[20].mxu0 %vm412_vm2, %v1728_v15  ;;  %1677 = vmatmul.mubr.msk.bf16.gmra.mrb[20].mxu1 %vm412_vm2, %v1740_v16 }
  0x3b   : > { %1628 = vmatprep.mubr.msk.bf16.mxu0 %vm1757_vm0, %v1756_v1  ;;  %1680 = vmatprep.mubr.msk.bf16.mxu1 %vm1757_vm0, %v1756_v1 }
  0x42   : > { %1629 = vmatmul.mubr.msk.bf16.gmra.mrb[24].mxu0 %vm412_vm2, %v1729_v17  ;;  %1681 = vmatmul.mubr.msk.bf16.gmra.mrb[24].mxu1 %vm412_vm2, %v1742_v18 }
  0x43   : > { %1632 = vmatprep.mubr.msk.bf16.mxu0 %vm1757_vm0, %v1756_v1  ;;  %1684 = vmatprep.mubr.msk.bf16.mxu1 %vm1757_vm0, %v1756_v1 }
  0x4a   : > { %1633 = vmatmul.mubr.msk.bf16.gmra.mrb[28].mxu0 %vm412_vm2, %v1731_v19  ;;  %1685 = vmatmul.mubr.msk.bf16.gmra.mrb[28].mxu1 %vm412_vm2, %v1743_v20 }
  0x4b   : > { %1636 = vmatprep.mubr.msk.bf16.mxu0 %vm1757_vm0, %v1756_v1  ;;  %1688 = vmatprep.mubr.msk.bf16.mxu1 %vm1757_vm0, %v1756_v1 }
  0x52   : > { %1637 = vmatmul.mubr.msk.bf16.gmra.mrb[32].mxu0 %vm412_vm2, %v1733_v21  ;;  %1689 = vmatmul.mubr.msk.bf16.gmra.mrb[32].mxu1 %vm412_vm2, %v1744_v22 }
  0x53   : > { %1640 = vmatprep.mubr.msk.bf16.mxu0 %vm1757_vm0, %v1756_v1  ;;  %1692 = vmatprep.mubr.msk.bf16.mxu1 %vm1757_vm0, %v1756_v1 }
  0x5a   : > { %1641 = vmatmul.mubr.msk.bf16.gmra.mrb[36].mxu0 %vm412_vm2, %v1735_v23  ;;  %1693 = vmatmul.mubr.msk.bf16.gmra.mrb[36].mxu1 %vm412_vm2, %v1745_v24 }
  0x5b   : > { %1644 = vmatprep.mubr.msk.bf16.mxu0 %vm1757_vm0, %v1756_v1  ;;  %1696 = vmatprep.mubr.msk.bf16.mxu1 %vm1757_vm0, %v1756_v1 }
  0x62   : > { %1645 = vmatmul.mubr.msk.bf16.gmra.mrb[40].mxu0 %vm412_vm2, %v1737_v25  ;;  %1697 = vmatmul.mubr.msk.bf16.gmra.mrb[40].mxu1 %vm412_vm2, %v1746_v26 }
  0x63   : > { %1648 = vmatprep.mubr.msk.bf16.mxu0 %vm1757_vm0, %v1756_v1  ;;  %1700 = vmatprep.mubr.msk.bf16.mxu1 %vm1757_vm0, %v1756_v1 }
  0x6a   : > { %1649 = vmatmul.mubr.msk.bf16.gmra.mrb[44].mxu0 %vm412_vm2, %v1739_v27  ;;  %1701 = vmatmul.mubr.msk.bf16.gmra.mrb[44].mxu1 %vm412_vm2, %v1747_v28 }
  0x6b   : > { %1652 = vmatprep.mubr.msk.bf16.mxu0 %vm1757_vm0, %v1756_v1 }
  0x72   : > { %1653 = vmatmul.mubr.msk.bf16.gmra.mrb[48].mxu0 %vm412_vm2, %v1741_v29 }
  0xe5   : > { %v526_v31 = vpop.f32.mrb[0].mxu0  ;;  %v630_v40 = vpop.f32.mrb[0].mxu1 }
  0xe6   : > { %v527_v32 = vadd.f32 %v1922_v30, %v526_v31  ;;  %v1606_v33 = vpop.f32.mrb[1].mxu0  ;;  %v631_v44 = vadd.f32 %v1922_v30, %v630_v40  ;;  %v1658_v45 = vpop.f32.mrb[1].mxu1 }
  0xe7   : > { %v529_v34 = vpop.f32.mrb[2].mxu0  ;;  %v633_v47 = vpop.f32.mrb[2].mxu1 }
  0xe8   : > { %v724_v35 = vmax.f32 %v527_v32, 0.0  ;;  %v530_v36 = vadd.f32 %v1922_v30, %v529_v34  ;;  %v1607_v37 = vpop.f32.mrb[3].mxu0  ;;  %v1936_v51 = vmax.f32 %v631_v44, 0.0  ;;  %v634_v52 = vadd.f32 %v1922_v30, %v633_v47  ;;  %v1659_v53 = vpop.f32.mrb[3].mxu1 }
  0xea   : > { %v725_v38 = vmax.f32 %v530_v36, 0.0  ;;  %v1074_v39 = vmul.f32 %v724_v35, %v724_v35  ;;  %v1940_v58 = vmax.f32 %v634_v52, 0.0 }
  0xec   : > { %v1430_v41 = vpack.c.bf16 %v725_v38, %v724_v35  ;;  %v1019_v42 = vadd.f32 %v725_v38, %v724_v35  ;;  %v1075_v43 = vmul.f32 %v725_v38, %v725_v38  ;;  %v1495_v62 = vpack.c.bf16 %v1940_v58, %v1936_v51 }
  0xed   : > { %v534_v46 = vpop.f32.mrb[4].mxu0  ;;  %v638_v63 = vpop.f32.mrb[4].mxu1 }
  0xee   : > { %1431 = vst [vmem:[%s1931_s6] sm:$0xff] %v1430_v41   ;;  %v1123_v48 = vadd.f32 %v1075_v43, %v1074_v39  ;;  %v535_v49 = vadd.f32 %v1922_v30, %v534_v46  ;;  %v1610_v50 = vpop.f32.mrb[5].mxu0  ;;  %1559 = vst [vmem:[%s1931_s6 + $0x68] sm:$0xff] %v1495_v62   ;;  %v1662_v4 = vpop.f32.mrb[5].mxu1  ;;  %v639_v6 = vadd.f32 %v1922_v30, %v638_v63 }
  0xef   : > { %v537_v54 = vpop.f32.mrb[6].mxu0  ;;  %v641_v7 = vpop.f32.mrb[6].mxu1 }
  0xf0   : > { %v726_v55 = vmax.f32 %v535_v49, 0.0  ;;  %v538_v56 = vadd.f32 %v1922_v30, %v537_v54  ;;  %v1611_v57 = vpop.f32.mrb[7].mxu0  ;;  %v642_v11 = vadd.f32 %v1922_v30, %v641_v7  ;;  %v1663_v12 = vpop.f32.mrb[7].mxu1  ;;  %v1949_v14 = vmax.f32 %v639_v6, 0.0 }
  0xf2   : > { %v1020_v59 = vadd.f32 %v1019_v42, %v726_v55  ;;  %v1076_v60 = vmul.f32 %v726_v55, %v726_v55  ;;  %v727_v61 = vmax.f32 %v538_v56, 0.0  ;;  %v1952_v18 = vmax.f32 %v642_v11, 0.0 }
  0xf4   : > { %v1124_v0 = vadd.f32 %v1123_v48, %v1076_v60  ;;  %v1435_v1 = vpack.c.bf16 %v727_v61, %v726_v55  ;;  %v1021_v2 = vadd.f32 %v1020_v59, %v727_v61  ;;  %v1077_v3 = vmul.f32 %v727_v61, %v727_v61 }
  0xf5   : > { %v542_v5 = vpop.f32.mrb[8].mxu0  ;;  %v1500_v22 = vpack.c.bf16 %v1952_v18, %v1949_v14  ;;  %v646_v23 = vpop.f32.mrb[8].mxu1 }
  0xf6   : > { %1547 = vst [vmem:[%s1931_s6 + $0x8] sm:$0xff] %v1435_v1   ;;  %v1125_v8 = vadd.f32 %v1124_v0, %v1077_v3  ;;  %v543_v9 = vadd.f32 %v1922_v30, %v542_v5  ;;  %v1614_v10 = vpop.f32.mrb[9].mxu0  ;;  %v1666_v28 = vpop.f32.mrb[9].mxu1  ;;  %v647_v31 = vadd.f32 %v1922_v30, %v646_v23 }
  0xf7   : > { %v545_v13 = vpop.f32.mrb[10].mxu0  ;;  %1560 = vst [vmem:[%s1931_s6 + $0x70] sm:$0xff] %v1500_v22   ;;  %v649_v32 = vpop.f32.mrb[10].mxu1 }
  0xf8   : > { %v728_v15 = vmax.f32 %v543_v9, 0.0  ;;  %v546_v16 = vadd.f32 %v1922_v30, %v545_v13  ;;  %v1615_v17 = vpop.f32.mrb[11].mxu0  ;;  %v650_v36 = vadd.f32 %v1922_v30, %v649_v32  ;;  %v1667_v37 = vpop.f32.mrb[11].mxu1  ;;  %v1961_v39 = vmax.f32 %v647_v31, 0.0 }
  0xfa   : > { %v1022_v19 = vadd.f32 %v1021_v2, %v728_v15  ;;  %v1078_v20 = vmul.f32 %v728_v15, %v728_v15  ;;  %v729_v21 = vmax.f32 %v546_v16, 0.0  ;;  %v1964_v43 = vmax.f32 %v650_v36, 0.0 }
  0xfc   : > { %v1126_v24 = vadd.f32 %v1125_v8, %v1078_v20  ;;  %v1440_v25 = vpack.c.bf16 %v729_v21, %v728_v15  ;;  %v1023_v26 = vadd.f32 %v1022_v19, %v729_v21  ;;  %v1079_v27 = vmul.f32 %v729_v21, %v729_v21 }
  0xfd   : > { %v550_v29 = vpop.f32.mrb[12].mxu0  ;;  %v1505_v47 = vpack.c.bf16 %v1964_v43, %v1961_v39  ;;  %v654_v48 = vpop.f32.mrb[12].mxu1 }
  0xfe   : > { %1548 = vst [vmem:[%s1931_s6 + $0x10] sm:$0xff] %v1440_v25   ;;  %v1127_v33 = vadd.f32 %v1126_v24, %v1079_v27  ;;  %v551_v34 = vadd.f32 %v1922_v30, %v550_v29  ;;  %v1618_v35 = vpop.f32.mrb[13].mxu0  ;;  %v1670_v54 = vpop.f32.mrb[13].mxu1  ;;  %v655_v56 = vadd.f32 %v1922_v30, %v654_v48 }
  0xff   : > { %v553_v38 = vpop.f32.mrb[14].mxu0  ;;  %1561 = vst [vmem:[%s1931_s6 + $0x78] sm:$0xff] %v1505_v47   ;;  %v657_v57 = vpop.f32.mrb[14].mxu1 }
 0x100   : > { %v730_v40 = vmax.f32 %v551_v34, 0.0  ;;  %v554_v41 = vadd.f32 %v1922_v30, %v553_v38  ;;  %v1619_v42 = vpop.f32.mrb[15].mxu0  ;;  %v658_v62 = vadd.f32 %v1922_v30, %v657_v57  ;;  %v1671_v63 = vpop.f32.mrb[15].mxu1  ;;  %v1973_v1 = vmax.f32 %v655_v56, 0.0 }
 0x102   : > { %v1024_v44 = vadd.f32 %v1023_v26, %v730_v40  ;;  %v1080_v45 = vmul.f32 %v730_v40, %v730_v40  ;;  %v731_v46 = vmax.f32 %v554_v41, 0.0  ;;  %v1976_v5 = vmax.f32 %v658_v62, 0.0 }
 0x104   : > { %v1128_v49 = vadd.f32 %v1127_v33, %v1080_v45  ;;  %v1445_v50 = vpack.c.bf16 %v731_v46, %v730_v40  ;;  %v1025_v52 = vadd.f32 %v1024_v44, %v731_v46  ;;  %v1081_v53 = vmul.f32 %v731_v46, %v731_v46 }
 0x105   : > { %v558_v55 = vpop.f32.mrb[16].mxu0  ;;  %v1510_v9 = vpack.c.bf16 %v1976_v5, %v1973_v1  ;;  %v662_v10 = vpop.f32.mrb[16].mxu1 }
 0x106   : > { %1549 = vst [vmem:[%s1931_s6 + $0x18] sm:$0xff] %v1445_v50   ;;  %v1129_v59 = vadd.f32 %v1128_v49, %v1081_v53  ;;  %v559_v60 = vadd.f32 %v1922_v30, %v558_v55  ;;  %v1622_v61 = vpop.f32.mrb[17].mxu0  ;;  %v1674_v16 = vpop.f32.mrb[17].mxu1  ;;  %v663_v19 = vadd.f32 %v1922_v30, %v662_v10 }
 0x107   : > { %v561_v0 = vpop.f32.mrb[18].mxu0  ;;  %1562 = vst [vmem:[%s1931_s6 + $0x80] sm:$0xff] %v1510_v9   ;;  %v665_v20 = vpop.f32.mrb[18].mxu1 }
 0x108   : > { %v732_v2 = vmax.f32 %v559_v60, 0.0  ;;  %v562_v3 = vadd.f32 %v1922_v30, %v561_v0  ;;  %v1623_v4 = vpop.f32.mrb[19].mxu0  ;;  %v666_v24 = vadd.f32 %v1922_v30, %v665_v20  ;;  %v1675_v25 = vpop.f32.mrb[19].mxu1  ;;  %v1985_v27 = vmax.f32 %v663_v19, 0.0 }
 0x10a   : > { %v1026_v6 = vadd.f32 %v1025_v52, %v732_v2  ;;  %v1082_v7 = vmul.f32 %v732_v2, %v732_v2  ;;  %v733_v8 = vmax.f32 %v562_v3, 0.0  ;;  %v1988_v32 = vmax.f32 %v666_v24, 0.0 }
 0x10c   : > { %v1130_v11 = vadd.f32 %v1129_v59, %v1082_v7  ;;  %v1450_v12 = vpack.c.bf16 %v733_v8, %v732_v2  ;;  %v1027_v13 = vadd.f32 %v1026_v6, %v733_v8  ;;  %v1083_v15 = vmul.f32 %v733_v8, %v733_v8 }
 0x10d   : > { %v566_v17 = vpop.f32.mrb[20].mxu0  ;;  %v1515_v36 = vpack.c.bf16 %v1988_v32, %v1985_v27  ;;  %v670_v37 = vpop.f32.mrb[20].mxu1 }
 0x10e   : > { %1550 = vst [vmem:[%s1931_s6 + $0x20] sm:$0xff] %v1450_v12   ;;  %v1131_v21 = vadd.f32 %v1130_v11, %v1083_v15  ;;  %v567_v22 = vadd.f32 %v1922_v30, %v566_v17  ;;  %v1626_v23 = vpop.f32.mrb[21].mxu0  ;;  %v1678_v44 = vpop.f32.mrb[21].mxu1  ;;  %v671_v46 = vadd.f32 %v1922_v30, %v670_v37 }
 0x10f   : > { %v569_v26 = vpop.f32.mrb[22].mxu0  ;;  %1563 = vst [vmem:[%s1931_s6 + $0x88] sm:$0xff] %v1515_v36   ;;  %v673_v47 = vpop.f32.mrb[22].mxu1 }
 0x110   : > { %v734_v28 = vmax.f32 %v567_v22, 0.0  ;;  %v570_v29 = vadd.f32 %v1922_v30, %v569_v26  ;;  %v1627_v31 = vpop.f32.mrb[23].mxu0  ;;  %v674_v52 = vadd.f32 %v1922_v30, %v673_v47  ;;  %v1679_v53 = vpop.f32.mrb[23].mxu1  ;;  %v1997_v55 = vmax.f32 %v671_v46, 0.0 }
 0x112   : > { %v1028_v33 = vadd.f32 %v1027_v13, %v734_v28  ;;  %v1084_v34 = vmul.f32 %v734_v28, %v734_v28  ;;  %v735_v35 = vmax.f32 %v570_v29, 0.0  ;;  %v2000_v60 = vmax.f32 %v674_v52, 0.0 }
 0x114   : > { %v1132_v38 = vadd.f32 %v1131_v21, %v1084_v34  ;;  %v1455_v40 = vpack.c.bf16 %v735_v35, %v734_v28  ;;  %v1029_v41 = vadd.f32 %v1028_v33, %v735_v35  ;;  %v1085_v42 = vmul.f32 %v735_v35, %v735_v35 }
 0x115   : > { %v574_v45 = vpop.f32.mrb[24].mxu0  ;;  %v1520_v0 = vpack.c.bf16 %v2000_v60, %v1997_v55  ;;  %v678_v2 = vpop.f32.mrb[24].mxu1 }
 0x116   : > { %1551 = vst [vmem:[%s1931_s6 + $0x28] sm:$0xff] %v1455_v40   ;;  %v1133_v48 = vadd.f32 %v1132_v38, %v1085_v42  ;;  %v575_v49 = vadd.f32 %v1922_v30, %v574_v45  ;;  %v1630_v50 = vpop.f32.mrb[25].mxu0  ;;  %v1682_v8 = vpop.f32.mrb[25].mxu1  ;;  %v679_v10 = vadd.f32 %v1922_v30, %v678_v2 }
 0x117   : > { %v577_v54 = vpop.f32.mrb[26].mxu0  ;;  %1564 = vst [vmem:[%s1931_s6 + $0x90] sm:$0xff] %v1520_v0   ;;  %v681_v11 = vpop.f32.mrb[26].mxu1 }
 0x118   : > { %v736_v56 = vmax.f32 %v575_v49, 0.0  ;;  %v578_v57 = vadd.f32 %v1922_v30, %v577_v54  ;;  %v1631_v59 = vpop.f32.mrb[27].mxu0  ;;  %v682_v16 = vadd.f32 %v1922_v30, %v681_v11  ;;  %v1683_v17 = vpop.f32.mrb[27].mxu1  ;;  %v2009_v20 = vmax.f32 %v679_v10, 0.0 }
 0x11a   : > { %v1030_v61 = vadd.f32 %v1029_v41, %v736_v56  ;;  %v1086_v62 = vmul.f32 %v736_v56, %v736_v56  ;;  %v737_v63 = vmax.f32 %v578_v57, 0.0  ;;  %v2012_v24 = vmax.f32 %v682_v16, 0.0 }
 0x11c   : > { %v1134_v3 = vadd.f32 %v1133_v48, %v1086_v62  ;;  %v1460_v4 = vpack.c.bf16 %v737_v63, %v736_v56  ;;  %v1031_v6 = vadd.f32 %v1030_v61, %v737_v63  ;;  %v1087_v7 = vmul.f32 %v737_v63, %v737_v63 }
 0x11d   : > { %v582_v9 = vpop.f32.mrb[28].mxu0  ;;  %v1525_v29 = vpack.c.bf16 %v2012_v24, %v2009_v20  ;;  %v686_v31 = vpop.f32.mrb[28].mxu1 }
 0x11e   : > { %1552 = vst [vmem:[%s1931_s6 + $0x30] sm:$0xff] %v1460_v4   ;;  %v1135_v12 = vadd.f32 %v1134_v3, %v1087_v7  ;;  %v583_v13 = vadd.f32 %v1922_v30, %v582_v9  ;;  %v1634_v15 = vpop.f32.mrb[29].mxu0  ;;  %v1686_v37 = vpop.f32.mrb[29].mxu1  ;;  %v687_v40 = vadd.f32 %v1922_v30, %v686_v31 }
 0x11f   : > { %v585_v19 = vpop.f32.mrb[30].mxu0  ;;  %1565 = vst [vmem:[%s1931_s6 + $0x98] sm:$0xff] %v1525_v29   ;;  %v689_v41 = vpop.f32.mrb[30].mxu1 }
 0x120   : > { %v738_v21 = vmax.f32 %v583_v13, 0.0  ;;  %v586_v22 = vadd.f32 %v1922_v30, %v585_v19  ;;  %v1635_v23 = vpop.f32.mrb[31].mxu0  ;;  %v690_v46 = vadd.f32 %v1922_v30, %v689_v41  ;;  %v1687_v47 = vpop.f32.mrb[31].mxu1  ;;  %v2021_v49 = vmax.f32 %v687_v40, 0.0 }
 0x122   : > { %v1032_v25 = vadd.f32 %v1031_v6, %v738_v21  ;;  %v1088_v26 = vmul.f32 %v738_v21, %v738_v21  ;;  %v739_v28 = vmax.f32 %v586_v22, 0.0  ;;  %v2024_v54 = vmax.f32 %v690_v46, 0.0 }
 0x124   : > { %v1136_v33 = vadd.f32 %v1135_v12, %v1088_v26  ;;  %v1465_v34 = vpack.c.bf16 %v739_v28, %v738_v21  ;;  %v1033_v35 = vadd.f32 %v1032_v25, %v739_v28  ;;  %v1089_v36 = vmul.f32 %v739_v28, %v739_v28 }
 0x125   : > { %v590_v38 = vpop.f32.mrb[32].mxu0  ;;  %v1530_v61 = vpack.c.bf16 %v2024_v54, %v2021_v49  ;;  %v694_v62 = vpop.f32.mrb[32].mxu1 }
 0x126   : > { %1553 = vst [vmem:[%s1931_s6 + $0x38] sm:$0xff] %v1465_v34   ;;  %v1137_v42 = vadd.f32 %v1136_v33, %v1089_v36  ;;  %v591_v44 = vadd.f32 %v1922_v30, %v590_v38  ;;  %v1638_v45 = vpop.f32.mrb[33].mxu0  ;;  %v1690_v4 = vpop.f32.mrb[33].mxu1  ;;  %v695_v7 = vadd.f32 %v1922_v30, %v694_v62 }
 0x127   : > { %v593_v48 = vpop.f32.mrb[34].mxu0  ;;  %1566 = vst [vmem:[%s1931_s6 + $0xa0] sm:$0xff] %v1530_v61   ;;  %v697_v8 = vpop.f32.mrb[34].mxu1 }
 0x128   : > { %v740_v50 = vmax.f32 %v591_v44, 0.0  ;;  %v594_v52 = vadd.f32 %v1922_v30, %v593_v48  ;;  %v1639_v53 = vpop.f32.mrb[35].mxu0  ;;  %v698_v12 = vadd.f32 %v1922_v30, %v697_v8  ;;  %v1691_v13 = vpop.f32.mrb[35].mxu1  ;;  %v2033_v16 = vmax.f32 %v695_v7, 0.0 }
 0x12a   : > { %v1034_v56 = vadd.f32 %v1033_v35, %v740_v50  ;;  %v1090_v57 = vmul.f32 %v740_v50, %v740_v50  ;;  %v741_v59 = vmax.f32 %v594_v52, 0.0  ;;  %v2036_v22 = vmax.f32 %v698_v12, 0.0 }
 0x12c   : > { %v1138_v63 = vadd.f32 %v1137_v42, %v1090_v57  ;;  %v1470_v0 = vpack.c.bf16 %v741_v59, %v740_v50  ;;  %v1035_v2 = vadd.f32 %v1034_v56, %v741_v59  ;;  %v1091_v3 = vmul.f32 %v741_v59, %v741_v59 }
 0x12d   : > { %v598_v6 = vpop.f32.mrb[36].mxu0  ;;  %v1535_v28 = vpack.c.bf16 %v2036_v22, %v2033_v16  ;;  %v702_v29 = vpop.f32.mrb[36].mxu1 }
 0x12e   : > { %1554 = vst [vmem:[%s1931_s6 + $0x40] sm:$0xff] %v1470_v0   ;;  %v1139_v9 = vadd.f32 %v1138_v63, %v1091_v3  ;;  %v599_v10 = vadd.f32 %v1922_v30, %v598_v6  ;;  %v1642_v11 = vpop.f32.mrb[37].mxu0  ;;  %v1694_v36 = vpop.f32.mrb[37].mxu1  ;;  %v703_v38 = vadd.f32 %v1922_v30, %v702_v29 }
 0x12f   : > { %v601_v15 = vpop.f32.mrb[38].mxu0  ;;  %1567 = vst [vmem:[%s1931_s6 + $0xa8] sm:$0xff] %v1535_v28   ;;  %v705_v40 = vpop.f32.mrb[38].mxu1 }
 0x130   : > { %v742_v17 = vmax.f32 %v599_v10, 0.0  ;;  %v602_v19 = vadd.f32 %v1922_v30, %v601_v15  ;;  %v1643_v21 = vpop.f32.mrb[39].mxu0  ;;  %v706_v45 = vadd.f32 %v1922_v30, %v705_v40  ;;  %v1695_v46 = vpop.f32.mrb[39].mxu1  ;;  %v2045_v48 = vmax.f32 %v703_v38, 0.0 }
 0x132   : > { %v1036_v23 = vadd.f32 %v1035_v2, %v742_v17  ;;  %v1092_v25 = vmul.f32 %v742_v17, %v742_v17  ;;  %v743_v26 = vmax.f32 %v602_v19, 0.0  ;;  %v2048_v56 = vmax.f32 %v706_v45, 0.0 }
 0x134   : > { %v1140_v31 = vadd.f32 %v1139_v9, %v1092_v25  ;;  %v1475_v33 = vpack.c.bf16 %v743_v26, %v742_v17  ;;  %v1037_v34 = vadd.f32 %v1036_v23, %v743_v26  ;;  %v1093_v35 = vmul.f32 %v743_v26, %v743_v26 }
 0x135   : > { %v606_v37 = vpop.f32.mrb[40].mxu0  ;;  %v1540_v62 = vpack.c.bf16 %v2048_v56, %v2045_v48  ;;  %v710_v63 = vpop.f32.mrb[40].mxu1 }
 0x136   : > { %1555 = vst [vmem:[%s1931_s6 + $0x48] sm:$0xff] %v1475_v33   ;;  %v1141_v41 = vadd.f32 %v1140_v31, %v1093_v35  ;;  %v607_v42 = vadd.f32 %v1922_v30, %v606_v37  ;;  %v1646_v44 = vpop.f32.mrb[41].mxu0  ;;  %v1698_v6 = vpop.f32.mrb[41].mxu1  ;;  %v711_v8 = vadd.f32 %v1922_v30, %v710_v63 }
 0x137   : > { %v609_v47 = vpop.f32.mrb[42].mxu0  ;;  %1568 = vst [vmem:[%s1931_s6 + $0xb0] sm:$0xff] %v1540_v62   ;;  %v713_v9 = vpop.f32.mrb[42].mxu1 }
 0x138   : > { %v744_v50 = vmax.f32 %v607_v42, 0.0  ;;  %v610_v52 = vadd.f32 %v1922_v30, %v609_v47  ;;  %v1647_v53 = vpop.f32.mrb[43].mxu0  ;;  %v714_v13 = vadd.f32 %v1922_v30, %v713_v9  ;;  %v1699_v15 = vpop.f32.mrb[43].mxu1  ;;  %v2057_v19 = vmax.f32 %v711_v8, 0.0 }
 0x139   : > { %v1100_v8 = vmul.f32 %v1936_v51, %v1936_v51 }
 0x13a   : > { %v1038_v57 = vadd.f32 %v1037_v34, %v744_v50  ;;  %v1094_v59 = vmul.f32 %v744_v50, %v744_v50  ;;  %v745_v61 = vmax.f32 %v610_v52, 0.0  ;;  %v2060_v26 = vmax.f32 %v714_v13, 0.0 }
 0x13b   : > { %v1102_v13 = vmul.f32 %v1949_v14, %v1949_v14 }
 0x13c   : > { %v1142_v0 = vadd.f32 %v1141_v41, %v1094_v59  ;;  %v1480_v2 = vpack.c.bf16 %v745_v61, %v744_v50  ;;  %v1039_v3 = vadd.f32 %v1038_v57, %v745_v61  ;;  %v1095_v4 = vmul.f32 %v745_v61, %v745_v61 }
 0x13d   : > { %v614_v7 = vpop.f32.mrb[44].mxu0  ;;  %v1545_v33 = vpack.c.bf16 %v2060_v26, %v2057_v19  ;;  %v718_v34 = vpop.f32.mrb[44].mxu1 }
 0x13e   : > { %1556 = vst [vmem:[%s1931_s6 + $0x50] sm:$0xff] %v1480_v2   ;;  %v1143_v10 = vadd.f32 %v1142_v0, %v1095_v4  ;;  %v615_v11 = vadd.f32 %v1922_v30, %v614_v7  ;;  %v1650_v12 = vpop.f32.mrb[45].mxu0  ;;  %v1702_v40 = vpop.f32.mrb[45].mxu1  ;;  %v719_v42 = vadd.f32 %v1922_v30, %v718_v34 }
 0x13f   : > { %v617_v17 = vpop.f32.mrb[46].mxu0  ;;  %1569 = vst [vmem:[%s1931_s6 + $0xb8] sm:$0xff] %v1545_v33   ;;  %v721_v44 = vpop.f32.mrb[46].mxu1 }
 0x140   : > { %v746_v21 = vmax.f32 %v615_v11, 0.0  ;;  %v618_v23 = vadd.f32 %v1922_v30, %v617_v17  ;;  %v1651_v25 = vpop.f32.mrb[47].mxu0  ;;  %v1703_v50 = vpop.f32.mrb[47].mxu1  ;;  %v2068_v53 = vmax.f32 %v719_v42, 0.0 }
 0x141   : > { %v1112_v50 = vmul.f32 %v2009_v20, %v2009_v20 }
 0x142   : > { %v1040_v28 = vadd.f32 %v1039_v3, %v746_v21  ;;  %v1096_v29 = vmul.f32 %v746_v21, %v746_v21  ;;  %v747_v31 = vmax.f32 %v618_v23, 0.0  ;;  %v1426_v62 = vpack.c.bf16 %v2068_v53, %v2068_v53 }
 0x144   : > { %v1144_v35 = vadd.f32 %v1143_v10, %v1096_v29  ;;  %v1485_v36 = vpack.c.bf16 %v747_v31, %v746_v21  ;;  %v1041_v37 = vadd.f32 %v1040_v28, %v747_v31  ;;  %v1097_v38 = vmul.f32 %v747_v31, %v747_v31  ;;  %1018 = vst [vmem:[%s1931_s6 + $0xc0] sm:$0xf] %v1426_v62 }
 0x145   : > { %v622_v41 = vpop.f32.mrb[48].mxu0  ;;  %v1103_v21 = vmul.f32 %v1952_v18, %v1952_v18  ;;  %v1114_v62 = vmul.f32 %v2021_v49, %v2021_v49 }
 0x146   : > { %1557 = vst [vmem:[%s1931_s6 + $0x58] sm:$0xff] %v1485_v36   ;;  %v1145_v45 = vadd.f32 %v1144_v35, %v1097_v38  ;;  %v623_v46 = vadd.f32 %v1922_v30, %v622_v41  ;;  %v1654_v47 = vpop.f32.mrb[49].mxu0 }
 0x147   : > { %v625_v52 = vpop.f32.mrb[50].mxu0 }
 0x148   : > { %v748_v57 = vmax.f32 %v623_v46, 0.0  ;;  %v626_v59 = vadd.f32 %v1922_v30, %v625_v52  ;;  %v1655_v61 = vpop.f32.mrb[51].mxu0  ;;  %v1101_v30 = vmul.f32 %v1940_v58, %v1940_v58 }
 0x14a   : > { %v1042_v63 = vadd.f32 %v1041_v37, %v748_v57  ;;  %v1098_v0 = vmul.f32 %v748_v57, %v748_v57  ;;  %v749_v2 = vmax.f32 %v626_v59, 0.0  ;;  %v1113_v59 = vmul.f32 %v2012_v24, %v2012_v24 }
 0x14c   : > { %v1146_v3 = vadd.f32 %v1145_v45, %v1098_v0  ;;  %v1490_v4 = vpack.c.bf16 %v749_v2, %v748_v57  ;;  %v1043_v6 = vadd.f32 %v1042_v63, %v749_v2  ;;  %v1099_v7 = vmul.f32 %v749_v2, %v749_v2 }
 0x14d   : > { %v1115_v0 = vmul.f32 %v2024_v54, %v2024_v54 }
 0x14e   : > { %1558 = vst [vmem:[%s1931_s6 + $0x60] sm:$0xff] %v1490_v4   ;;  %v1044_v9 = vadd.f32 %v1043_v6, %v1936_v51  ;;  %v1147_v10 = vadd.f32 %v1146_v3, %v1099_v7  ;;  %v1104_v51 = vmul.f32 %v1961_v39, %v1961_v39  ;;  %v1116_v3 = vmul.f32 %v2033_v16, %v2033_v16 }
 0x14f   : > { %v1117_v6 = vmul.f32 %v2036_v22, %v2036_v22 }
 0x150   : > { %v1045_v11 = vadd.f32 %v1044_v9, %v1940_v58  ;;  %v1148_v12 = vadd.f32 %v1147_v10, %v1100_v8  ;;  %v1105_v58 = vmul.f32 %v1964_v43, %v1964_v43  ;;  %v1118_v8 = vmul.f32 %v2045_v48, %v2045_v48 }
 0x152   : > { %v1046_v15 = vadd.f32 %v1045_v11, %v1949_v14  ;;  %v1149_v17 = vadd.f32 %v1148_v12, %v1101_v30  ;;  %v1106_v14 = vmul.f32 %v1973_v1, %v1973_v1  ;;  %v1120_v11 = vmul.f32 %v2057_v19, %v2057_v19 }
 0x154   : > { %v1047_v23 = vadd.f32 %v1046_v15, %v1952_v18  ;;  %v1150_v25 = vadd.f32 %v1149_v17, %v1102_v13  ;;  %v1107_v18 = vmul.f32 %v1976_v5, %v1976_v5  ;;  %v1121_v13 = vmul.f32 %v2060_v26, %v2060_v26 }
 0x156   : > { %v1048_v28 = vadd.f32 %v1047_v23, %v1961_v39  ;;  %v1151_v29 = vadd.f32 %v1150_v25, %v1103_v21  ;;  %v1108_v39 = vmul.f32 %v1985_v27, %v1985_v27 }
 0x158   : > { %v1049_v31 = vadd.f32 %v1048_v28, %v1964_v43  ;;  %v1152_v33 = vadd.f32 %v1151_v29, %v1104_v51  ;;  %v1109_v43 = vmul.f32 %v1988_v32, %v1988_v32 }
 0x15a   : > { %v1153_v34 = vadd.f32 %v1152_v33, %v1105_v58  ;;  %v1050_v35 = vadd.f32 %v1049_v31, %v1973_v1  ;;  %v1110_v1 = vmul.f32 %v1997_v55, %v1997_v55 }
 0x15c   : > { %v1051_v36 = vadd.f32 %v1050_v35, %v1976_v5  ;;  %v1154_v37 = vadd.f32 %v1153_v34, %v1106_v14  ;;  %v1111_v5 = vmul.f32 %v2000_v60, %v2000_v60 }
 0x15e   : > { %v1052_v38 = vadd.f32 %v1051_v36, %v1985_v27  ;;  %v1155_v40 = vadd.f32 %v1154_v37, %v1107_v18 }
 0x160   : > { %v1053_v41 = vadd.f32 %v1052_v38, %v1988_v32  ;;  %v1156_v42 = vadd.f32 %v1155_v40, %v1108_v39 }
 0x162   : > { %v1054_v44 = vadd.f32 %v1053_v41, %v1997_v55  ;;  %v1157_v45 = vadd.f32 %v1156_v42, %v1109_v43 }
 0x164   : > { %v1055_v46 = vadd.f32 %v1054_v44, %v2000_v60  ;;  %v1158_v47 = vadd.f32 %v1157_v45, %v1110_v1 }
 0x166   : > { %v1056_v27 = vadd.f32 %v1055_v46, %v2009_v20  ;;  %v1159_v52 = vadd.f32 %v1158_v47, %v1111_v5 }
 0x168   : > { %v1160_v32 = vadd.f32 %v1159_v52, %v1112_v50  ;;  %v1057_v57 = vadd.f32 %v1056_v27, %v2012_v24 }
 0x16a   : > { %v1161_v55 = vadd.f32 %v1160_v32, %v1113_v59  ;;  %v1058_v61 = vadd.f32 %v1057_v57, %v2021_v49 }
 0x16c   : > { %v1162_v60 = vadd.f32 %v1161_v55, %v1114_v62  ;;  %v1059_v63 = vadd.f32 %v1058_v61, %v2024_v54 }
 0x16e   : > { %v1163_v20 = vadd.f32 %v1162_v60, %v1115_v0  ;;  %v1060_v2 = vadd.f32 %v1059_v63, %v2033_v16  ;;  %v1119_v16 = vmul.f32 %v2048_v56, %v2048_v56 }
 0x170   : > { %v1164_v4 = vadd.f32 %v1163_v20, %v1116_v3  ;;  %v1061_v24 = vadd.f32 %v1060_v2, %v2036_v22 }
 0x172   : > { %v1165_v49 = vadd.f32 %v1164_v4, %v1117_v6  ;;  %v1062_v7 = vadd.f32 %v1061_v24, %v2045_v48  ;;  %v1122_v48 = vmul.f32 %v2068_v53, %v2068_v53 }
 0x174   : > { %v1166_v54 = vadd.f32 %v1165_v49, %v1118_v8  ;;  %v1063_v9 = vadd.f32 %v1062_v7, %v2048_v56 }
 0x176   : > { %v1167_v10 = vadd.f32 %v1166_v54, %v1119_v16  ;;  %v1064_v30 = vadd.f32 %v1063_v9, %v2057_v19 }
 0x178   : > { %v1168_v22 = vadd.f32 %v1167_v10, %v1120_v11  ;;  %v1065_v12 = vadd.f32 %v1064_v30, %v2060_v26 }
 0x17a   : > { %v1169_v15 = vadd.f32 %v1168_v22, %v1121_v13  ;;  %v1066_v17 = vadd.f32 %v1065_v12, %v2068_v53 }
 0x17c   : > { %v1067_v56 = vrot.slane %v1066_v17, 4  ;;  %v1170_v21 = vadd.f32 %v1169_v15, %v1122_v48 }
 0x17e   : > { %v1068_v23 = vadd.f32 %v1067_v56, %v1066_v17  ;;  %v1171_v25 = vrot.slane %v1170_v21, 4 }
 0x180   : > { %v1069_v51 = vrot.slane %v1068_v23, 2  ;;  %v1172_v19 = vadd.f32 %v1171_v25, %v1170_v21 }
 0x182   : > { %v1070_v28 = vadd.f32 %v1069_v51, %v1068_v23  ;;  %v1173_v29 = vrot.slane %v1172_v19, 2 }
 0x184   : > { %v1071_v58 = vrot.slane %v1070_v28, 1  ;;  %v1174_v31 = vadd.f32 %v1173_v29, %v1172_v19 }
 0x186   : > { %v1072_v26 = vadd.f32 %v1071_v58, %v1070_v28  ;;  %v1175_v33 = vrot.slane %v1174_v31, 1 }
 0x188   : > { %1073 = vst [vmem:[%s211_s10] sm:$0x1] %v1072_v26  ;;  %v1176_v53 = vadd.f32 %v1175_v33, %v1174_v31 }
 0x18a   : > { %1177 = vst [vmem:[%s211_s10 + $0x1] sm:$0x1] %v1176_v53 }
 0x18b PF: > { %s15_s15 = sadd.s32 1, %s1754_s15  }
 0x18c   : > { %p12_p5 = scmp.ge.s32.totalorder %s15_s15, 4  }
 0x18e   :  { %14 = sbr.rel (!%p12_p5) target bundleno = 1 (0x1), region = 74 }

// kernel: s_encdec_forward.3
= control target key start
LH: loop header
LB: loop body
LE: loop exit
PB: predicated region body
PF: predicated region fallthrough
CT: control target
= control target key end

     0   :  { %s655_s15 = smov 0   ;;  %s718_s0 = inlined_call_operand.vmem [shape: bf16[144,72], index: 0, kind: input, shape index: {}]   ;;  %s719_s1 = inlined_call_operand.vmem [shape: bf16[72,128], index: 1, kind: input, shape index: {}]   ;;  %s720_s2 = inlined_call_operand.vmem [shape: f32[1,128], index: 2, kind: input, shape index: {}]   ;;  %s721_s3 = inlined_call_operand.vmem [shape: f32[144,128], index: 3, kind: output, shape index: {0}]   ;;  %s722_s4 = inlined_call_operand.vmem [shape: f32[2,2,128], index: 4, kind: output, shape index: {1}]  }
   0x1 LB: > { %s661_s16 = sadd.s32 4294967295, %s626_s15   ;;  %p528_p0 = scmp.ge.s32.totalorder %s626_s15, 1  ;;  %s626_s15 = sphi %s655_s15, %s15_s15  }
   0x2   : > { %p166_p1 = scmp.lt.s32.totalorder %s626_s15, 3 }
   0x4   : > { %p167_p2 = pnand %p528_p0, %p166_p1 }
   0x5   : > { %v610_v0 = vld [vmem:[%s719_s1] sm:$0xff] (!%p167_p2)   ;;  %v628_v1 = vmov (!%p167_p2), 0.0   ;;  %v611_v2 = vld [vmem:[%s719_s1 + $0x8] sm:$0xff] (!%p167_p2)   ;;  %s196_s21 = smul.u32 (!%p167_p2), 9, %s661_s16  ;;  %vm629_vm0 = vmmov (!%p167_p2), 0   ;;  %v612_v3 = vld [vmem:[%s719_s1 + $0x10] sm:$0xff] (!%p167_p2)  }
   0x6   : > { %170 = sbr.rel (%p167_p2) target bundleno = 283 (0x11b), region = 32  ;;  %560 = vmatprep.subr.bf16.mxu0 (!%p167_p2), %v628_v1  ;;  %590 = vmatprep.subr.bf16.mxu1 (!%p167_p2), %v628_v1  ;;  %v613_v4 = vld [vmem:[%s719_s1 + $0x18] sm:$0xff] (!%p167_p2)   ;;  %v614_v5 = vld [vmem:[%s719_s1 + $0x20] ss:$0 sps:$4 sm:$0xff] (!%p167_p2)   ;;  %vm304_vm1 = vcmask (!%p167_p2), 1043456   ;;  %vm288_vm2 = vcmask (!%p167_p2), 588800  }
   0x7   : > { %561 = vmatpush3.bf16.msra.mxu0 (!%p167_p2), %v610_v0  ;;  %595 = vmatpush3.bf16.msra.mxu1 (!%p167_p2), %v610_v0  ;;  %p197_p3 = scmp.lt.s32.totalorder (!%p167_p2), %s196_s21, 17  ;;  %v306_v6 = vsel (!%p167_p2), %vm304_vm1, %v614_v5, 0  ;;  %v532_v12 = vld [vmem:[%s720_s2] ss:$0 sm:$0xff] (!%p167_p2)  ;;  %p208_p4 = scmp.lt.s32.totalorder (!%p167_p2), %s661_s16, 1 }
   0x8   : > { %562 = vmatprep.subr.bf16.mxu0 (!%p167_p2), %v628_v1  ;;  %591 = vmatprep.subr.bf16.mxu1 (!%p167_p2), %v628_v1 }
   0x9   : > { %570 = vmatprep.mubr.msk.bf16.mxu0 (!%p167_p2), %vm629_vm0, %v628_v1  ;;  %582 = vmatprep.mubr.msk.bf16.mxu1 (!%p167_p2), %vm629_vm0, %v628_v1 }
   0xb   : > { %563 = vmatpush3.bf16.msra.mxu0 (!%p167_p2), %v611_v2  ;;  %596 = vmatpush3.bf16.msra.mxu1 (!%p167_p2), %v611_v2 }
   0xc   : > { %564 = vmatprep.subr.bf16.mxu0 (!%p167_p2), %v628_v1  ;;  %592 = vmatprep.subr.bf16.mxu1 (!%p167_p2), %v628_v1 }
   0xd   : > { %s724_s21 = smov (!%p197_p3, %s196_s21), 17  ;;  %s726_s16 = smov (!%p208_p4, %s661_s16), 1 }
   0xe   : > { %s529_s24 = sshll.u32 %s724_s21, 2  ;;  %s530_s8 = sshll.u32 %s724_s21, 3 }
   0xf   : > { %565 = vmatpush3.bf16.msra.mxu0 %v612_v3  ;;  %s200_s29 = scalar_lea.vmem %s718_s0, %s529_s24  ;;  %597 = vmatpush3.bf16.msra.mxu1 %v612_v3  ;;  %s699_s11 = scalar_lea.vmem %s721_s3, %s530_s8 }
  0x10   : > { %566 = vmatprep.subr.bf16.mxu0 %v628_v1  ;;  %593 = vmatprep.subr.bf16.mxu1 %v628_v1  ;;  %v615_v7 = vld [vmem:[%s200_s29] sm:$0xff]   ;;  %v617_v8 = vld [vmem:[%s200_s29 + $0x18] sm:$0xff]   ;;  %v616_v9 = vld [vmem:[%s200_s29 + $0x8] sm:$0xff]   ;;  %s531_s12 = sshll.u32 %s726_s16, 1 }
  0x11   : > { %v619_v10 = vld [vmem:[%s200_s29 + $0x20] ss:$0 sps:$4 sm:$0xff]   ;;  %v618_v11 = vld [vmem:[%s200_s29 + $0x10] sm:$0xff]   ;;  %s211_s17 = scalar_lea.vmem %s722_s4, %s531_s12 }
  0x13   : > { %567 = vmatpush3.bf16.msra.mxu0 %v613_v4  ;;  %598 = vmatpush3.bf16.msra.mxu1 %v613_v4 }
  0x14   : > { %568 = vmatprep.subr.bf16.mxu0 %v628_v1  ;;  %594 = vmatprep.subr.bf16.mxu1 %v628_v1 }
  0x17   : > { %569 = vmatpush3.bf16.msra.mxu0 %v306_v6  ;;  %599 = vmatpush3.bf16.msra.mxu1 %v306_v6 }
  0x1a   : > { %571 = vmatmul.mubr.msk.bf16.vlgmr.msra.gmra.mrb[0].mxu0 %vm288_vm2, %v615_v7  ;;  %583 = vmatmul.mubr.msk.bf16.vlgmr.msra.gmra.mrb[0].mxu1 %vm288_vm2, %v617_v8 }
  0x1b   : > { %574 = vmatprep.mubr.msk.bf16.mxu0 %vm629_vm0, %v628_v1  ;;  %586 = vmatprep.mubr.msk.bf16.mxu1 %vm629_vm0, %v628_v1 }
  0x22   : > { %575 = vmatmul.mubr.msk.bf16.gmra.mrb[4].mxu0 %vm288_vm2, %v616_v9  ;;  %587 = vmatmul.mubr.msk.bf16.gmra.mrb[4].mxu1 %vm288_vm2, %v619_v10 }
  0x23   : > { %578 = vmatprep.mubr.msk.bf16.mxu0 %vm629_vm0, %v628_v1 }
  0x2a   : > { %579 = vmatmul.mubr.msk.bf16.gmra.mrb[8].mxu0 %vm288_vm2, %v618_v11 }
  0xed   : > { %v342_v13 = vpop.f32.mrb[0].mxu0  ;;  %v366_v14 = vpop.f32.mrb[0].mxu1 }
  0xee   : > { %v343_v15 = vadd.f32 %v532_v12, %v342_v13  ;;  %v572_v16 = vpop.f32.mrb[1].mxu0  ;;  %v367_v17 = vadd.f32 %v532_v12, %v366_v14  ;;  %v584_v18 = vpop.f32.mrb[1].mxu1 }
  0xef   : > { %v345_v19 = vpop.f32.mrb[2].mxu0  ;;  %v369_v20 = vpop.f32.mrb[2].mxu1 }
  0xf0   : > { %v380_v21 = vmax.f32 %v343_v15, 0.0  ;;  %v346_v22 = vadd.f32 %v532_v12, %v345_v19  ;;  %v573_v23 = vpop.f32.mrb[3].mxu0  ;;  %v386_v24 = vmax.f32 %v367_v17, 0.0  ;;  %v370_v25 = vadd.f32 %v532_v12, %v369_v20  ;;  %v585_v26 = vpop.f32.mrb[3].mxu1 }
  0xf2   : > { %389 = vst [vmem:[%s699_s11] sm:$0xff] %v380_v21  ;;  %v381_v27 = vmax.f32 %v346_v22, 0.0  ;;  %395 = vst [vmem:[%s699_s11 + $0x30] sm:$0xff] %v386_v24  ;;  %v387_v28 = vmax.f32 %v370_v25, 0.0  ;;  %v413_v29 = vmul.f32 %v380_v21, %v380_v21  ;;  %v419_v2 = vmul.f32 %v386_v24, %v386_v24 }
  0xf4   : > { %390 = vst [vmem:[%s699_s11 + $0x8] sm:$0xff] %v381_v27  ;;  %v398_v30 = vadd.f32 %v381_v27, %v380_v21  ;;  %v414_v31 = vmul.f32 %v381_v27, %v381_v27  ;;  %396 = vst [vmem:[%s699_s11 + $0x38] sm:$0xff] %v387_v28  ;;  %v420_v5 = vmul.f32 %v387_v28, %v387_v28 }
  0xf5   : > { %v350_v32 = vpop.f32.mrb[4].mxu0  ;;  %v374_v33 = vpop.f32.mrb[4].mxu1 }
  0xf6   : > { %v422_v34 = vadd.f32 %v414_v31, %v413_v29  ;;  %v351_v35 = vadd.f32 %v532_v12, %v350_v32  ;;  %v576_v36 = vpop.f32.mrb[5].mxu0  ;;  %v375_v37 = vadd.f32 %v532_v12, %v374_v33  ;;  %v588_v38 = vpop.f32.mrb[5].mxu1 }
  0xf7   : > { %v353_v39 = vpop.f32.mrb[6].mxu0  ;;  %v377_v40 = vpop.f32.mrb[6].mxu1 }
  0xf8   : > { %v382_v41 = vmax.f32 %v351_v35, 0.0  ;;  %v354_v42 = vadd.f32 %v532_v12, %v353_v39  ;;  %v577_v43 = vpop.f32.mrb[7].mxu0  ;;  %v388_v44 = vmax.f32 %v375_v37, 0.0  ;;  %v589_v45 = vpop.f32.mrb[7].mxu1 }
  0xfa   : > { %391 = vst [vmem:[%s699_s11 + $0x10] sm:$0xff] %v382_v41  ;;  %v399_v46 = vadd.f32 %v398_v30, %v382_v41  ;;  %v415_v47 = vmul.f32 %v382_v41, %v382_v41  ;;  %v383_v48 = vmax.f32 %v354_v42, 0.0  ;;  %397 = vst [vmem:[%s699_s11 + $0x40] sm:$0xff] %v388_v44  ;;  %v421_v8 = vmul.f32 %v388_v44, %v388_v44 }
  0xfc   : > { %v423_v49 = vadd.f32 %v422_v34, %v415_v47  ;;  %392 = vst [vmem:[%s699_s11 + $0x18] sm:$0xff] %v383_v48  ;;  %v400_v50 = vadd.f32 %v399_v46, %v383_v48  ;;  %v416_v51 = vmul.f32 %v383_v48, %v383_v48 }
  0xfd   : > { %v358_v52 = vpop.f32.mrb[8].mxu0 }
  0xfe   : > { %v424_v53 = vadd.f32 %v423_v49, %v416_v51  ;;  %v359_v54 = vadd.f32 %v532_v12, %v358_v52  ;;  %v580_v55 = vpop.f32.mrb[9].mxu0 }
  0xff   : > { %v361_v56 = vpop.f32.mrb[10].mxu0 }
 0x100   : > { %v384_v57 = vmax.f32 %v359_v54, 0.0  ;;  %v362_v58 = vadd.f32 %v532_v12, %v361_v56  ;;  %v581_v59 = vpop.f32.mrb[11].mxu0 }
 0x102   : > { %393 = vst [vmem:[%s699_s11 + $0x20] sm:$0xff] %v384_v57  ;;  %v401_v60 = vadd.f32 %v400_v50, %v384_v57  ;;  %v417_v61 = vmul.f32 %v384_v57, %v384_v57  ;;  %v385_v62 = vmax.f32 %v362_v58, 0.0 }
 0x104   : > { %v425_v63 = vadd.f32 %v424_v53, %v417_v61  ;;  %394 = vst [vmem:[%s699_s11 + $0x28] sm:$0xff] %v385_v62  ;;  %v402_v0 = vadd.f32 %v401_v60, %v385_v62  ;;  %v418_v1 = vmul.f32 %v385_v62, %v385_v62 }
 0x106   : > { %v403_v3 = vadd.f32 %v402_v0, %v386_v24  ;;  %v426_v4 = vadd.f32 %v425_v63, %v418_v1 }
 0x108   : > { %v427_v6 = vadd.f32 %v426_v4, %v419_v2  ;;  %v404_v7 = vadd.f32 %v403_v3, %v387_v28 }
 0x10a   : > { %v405_v9 = vadd.f32 %v404_v7, %v388_v44  ;;  %v428_v10 = vadd.f32 %v427_v6, %v420_v5 }
 0x10c   : > { %v406_v11 = vrot.slane %v405_v9, 4  ;;  %v429_v12 = vadd.f32 %v428_v10, %v421_v8 }
 0x10e   : > { %v407_v13 = vadd.f32 %v406_v11, %v405_v9  ;;  %v430_v14 = vrot.slane %v429_v12, 4 }
 0x110   : > { %v408_v15 = vrot.slane %v407_v13, 2  ;;  %v431_v16 = vadd.f32 %v430_v14, %v429_v12 }
 0x112   : > { %v409_v17 = vadd.f32 %v408_v15, %v407_v13  ;;  %v432_v18 = vrot.slane %v431_v16, 2 }
 0x114   : > { %v410_v19 = vrot.slane %v409_v17, 1  ;;  %v433_v20 = vadd.f32 %v432_v18, %v431_v16 }
 0x116   : > { %v411_v21 = vadd.f32 %v410_v19, %v409_v17  ;;  %v434_v22 = vrot.slane %v433_v20, 1 }
 0x118   : > { %412 = vst [vmem:[%s211_s17] sm:$0x1] %v411_v21  ;;  %v435_v23 = vadd.f32 %v434_v22, %v433_v20 }
 0x11a   : > { %436 = vst [vmem:[%s211_s17 + $0x1] sm:$0x1] %v435_v23 }
 0x11b PF: > { %s15_s15 = sadd.s32 1, %s626_s15  }
 0x11c   : > { %p12_p5 = scmp.ge.s32.totalorder %s15_s15, 4  }
 0x11e   :  { %14 = sbr.rel (!%p12_p5) target bundleno = 1 (0x1), region = 74 }

</bundles_post_ra>
